<compile_context>
chip_gen: v7x
topology: tpu7x:2x2x1
jax: 0.10.0
libtpu: 0.0.40
codegen_flags: <defaults>
</compile_context>

<pallas_src>
import functools

import jax
import jax.numpy as jnp
import numpy as np
from jax.experimental import pallas as pl
from jax.experimental.pallas import tpu as pltpu


def _build_pe_table(d_model: int, max_len: int) -> jnp.ndarray:
    """Sinusoidal PE table matching the PyTorch module, shape (max_len, 1, d_model)."""
    position = np.arange(0, max_len, dtype=np.float32)[:, None]            # (L, 1)
    div_term = np.exp(np.arange(0, d_model, 2, dtype=np.float32)
                      * (-np.log(10000.0) / d_model))                       # (D/2,)
    pe = np.zeros((max_len, d_model), dtype=np.float32)
    pe[:, 0::2] = np.sin(position * div_term)
    pe[:, 1::2] = np.cos(position * div_term)
    return jnp.asarray(pe[:, None, :])                                      # (L, 1, D)


def _pe_add_kernel(x_ref, pe_ref, o_ref):
    # (TS, B, D) + (TS, 1, D): broadcast over the batch axis, accumulate in f32.
    val = x_ref[...].astype(jnp.float32) + pe_ref[...]
    o_ref[...] = val.astype(o_ref.dtype)


def _pe_add_dropout_kernel(x_ref, pe_ref, bits_ref, o_ref, *, threshold, scale):
    val = x_ref[...].astype(jnp.float32) + pe_ref[...]
    # Integer-domain keep/drop: P(bits < threshold) == dropout_p.  Avoids the
    # shift / f32 cast / 2^-24 multiply of a float-uniform compare.
    keep = bits_ref[...] >= np.uint32(threshold)
    val = jnp.where(keep, val * scale, 0.0)
    o_ref[...] = val.astype(o_ref.dtype)


def _pick_seq_tile(S, B, D, x_itemsize, with_bits):
    """Sequence rows per grid step, sized for a conservative VMEM budget.

    Pallas double-buffers every block, so the resident footprint is ~2x the
    per-tile sum.  A 4 MiB per-tile budget keeps the pipeline under v5e's
    16 MiB scoped-VMEM default and well under v7x's 32 MiB scoped / 64 MiB
    physical VMEM, while staying far above the ~0.35 us-per-step overhead
    regime for realistic B*D.
    """
    per_row = B * D * x_itemsize * 2          # x tile + out tile
    if with_bits:
        per_row += B * D * 4                  # uint32 dropout-bits tile
    per_row += D * 4                          # f32 PE row
    budget = 4 * 1024 * 1024
    return max(1, min(S, budget // per_row))


def positional_encoding_forward(x, pe_table, *, dropout_p=0.1, training=False,
                                rng_key=None):
    """x: (S, B, D).  pe_table: (max_len, 1, D) float32.  Returns (S, B, D)."""
    S, B, D = x.shape
    max_len = pe_table.shape[0]
    assert S <= max_len, "sequence length exceeds the PE table"

    apply_dropout = bool(training) and float(dropout_p) > 0.0
    ts = _pick_seq_tile(S, B, D, jnp.dtype(x.dtype).itemsize, apply_dropout)
    grid = (pl.cdiv(S, ts),)

    # Blocks are lane-dense whenever d_model is a multiple of 128 (the realistic
    # transformer case); the tiny demo (B=2, D=32) is inherently lane-sparse.
    x_spec = pl.BlockSpec((ts, B, D), lambda i: (i, 0, 0))
    # Full (max_len, 1, D) table is passed; the index_map picks the S-tile, so
    # no sliced copy of the table is materialized in HBM before the call.
    pe_spec = pl.BlockSpec((ts, 1, D), lambda i: (i, 0, 0))
    out_spec = pl.BlockSpec((ts, B, D), lambda i: (i, 0, 0))

    compiler_params = pltpu.CompilerParams(
        # Sequence tiles are independent -> shard the axis across v7x's 2 TCs.
        dimension_semantics=("parallel",),
    )
    out_shape = jax.ShapeDtypeStruct((S, B, D), x.dtype)

    if not apply_dropout:
        return pl.pallas_call(
            _pe_add_kernel,
            out_shape=out_shape,
            grid=grid,
            in_specs=[x_spec, pe_spec],
            out_specs=out_spec,
            compiler_params=compiler_params,
        )(x, pe_table)

    if rng_key is None:
        rng_key = jax.random.PRNGKey(0)
    # TODO(synk): on hardware-only deployments this could use in-kernel
    # pltpu.prng_random_bits (seeded with seed + pl.program_id(0) per tile) to
    # avoid the extra HBM read of the bits tensor; the stateful TPU PRNG has no
    # CPU/interpret lowering, so portable uint32 bits are streamed instead.
    bits = jax.random.bits(rng_key, (S, B, D), dtype=jnp.uint32)
    threshold = min(int(round(float(dropout_p) * 4294967296.0)), 4294967295)
    scale = 1.0 / (1.0 - float(dropout_p))
    kernel = functools.partial(_pe_add_dropout_kernel,
                               threshold=threshold, scale=scale)
    bits_spec = pl.BlockSpec((ts, B, D), lambda i: (i, 0, 0))

    return pl.pallas_call(
        kernel,
        out_shape=out_shape,
        grid=grid,
        in_specs=[x_spec, pe_spec, bits_spec],
        out_specs=out_spec,
        compiler_params=compiler_params,
    )(x, pe_table, bits)


if __name__ == "__main__":
    d_model = 32
    max_len = 100
    seq_len = 8
    batch = 2
    dropout_p = 0.1

    key = jax.random.PRNGKey(0)
    x = jax.random.normal(key, (seq_len, batch, d_model), dtype=jnp.float32)
    pe_table = _build_pe_table(d_model, max_len)

    ref = np.asarray(x) + np.asarray(pe_table[:seq_len])

    # Eval mode: dropout is identity -> exact check against the reference.
    out_eval = positional_encoding_forward(x, pe_table, dropout_p=dropout_p,
                                           training=False)
    jax.block_until_ready(out_eval)
    np.testing.assert_allclose(np.asarray(out_eval), ref, rtol=1e-6, atol=1e-6)

    # Training mode: inverted dropout.  Kept elements must equal ref/(1-p);
    # dropped elements are exactly zero.
    out_train = positional_encoding_forward(
        x, pe_table, dropout_p=dropout_p, training=True,
        rng_key=jax.random.PRNGKey(1234))
    jax.block_until_ready(out_train)
    out_t = np.asarray(out_train)
    assert out_t.shape == (seq_len, batch, d_model)
    kept = out_t != 0.0
    np.testing.assert_allclose(out_t[kept], ref[kept] / (1.0 - dropout_p),
                               rtol=1e-5, atol=1e-5)

    print("KERNEL_OK")
</pallas_src>

<mosaic_0001>
module attributes {stable_mosaic.version = 11 : i64} {
  func.func @_pe_add_kernel(%arg0: i32, %arg1: memref<8x2x32xf32, #tpu.memory_space<vmem>>, %arg2: memref<8x1x32xf32, #tpu.memory_space<vmem>>, %arg3: memref<8x2x32xf32, #tpu.memory_space<vmem>>) attributes {dimension_semantics = [#tpu.dimension_semantics<parallel>], iteration_bounds = array<i64: 1>, scalar_prefetch = 0 : i64, scratch_operands = 0 : i64, tpu.core_type = #tpu.core_type<tc>, window_params = [{transform_indices = @transform_0, window_bounds = array<i64: 8, 2, 32>}, {transform_indices = @transform_1, window_bounds = array<i64: 8, 1, 32>}, {transform_indices = @transform_2, window_bounds = array<i64: 8, 2, 32>}]} {
    %c0 = arith.constant 0 : index
    %c0_0 = arith.constant 0 : index
    %c0_1 = arith.constant 0 : index
    %0 = vector.load %arg1[%c0, %c0_0, %c0_1] : memref<8x2x32xf32, #tpu.memory_space<vmem>>, vector<8x2x32xf32>
    %c0_2 = arith.constant 0 : index
    %c0_3 = arith.constant 0 : index
    %c0_4 = arith.constant 0 : index
    %1 = vector.load %arg2[%c0_2, %c0_3, %c0_4] : memref<8x1x32xf32, #tpu.memory_space<vmem>>, vector<8x1x32xf32>
    %2 = vector.broadcast %1 : vector<8x1x32xf32> to vector<8x2x32xf32>
    %3 = arith.addf %0, %2 : vector<8x2x32xf32>
    %c0_5 = arith.constant 0 : index
    %c0_6 = arith.constant 0 : index
    %c0_7 = arith.constant 0 : index
    %4 = vector.load %arg3[%c0_5, %c0_6, %c0_7] : memref<8x2x32xf32, #tpu.memory_space<vmem>>, vector<8x2x32xf32>
    tpu.vector_store %arg3[%c0_5, %c0_6, %c0_7], %3 {strides = array<i32>} : memref<8x2x32xf32, #tpu.memory_space<vmem>>, vector<8x2x32xf32>,
    return
  }
  func.func @transform_0(%arg0: i32) -> (i32, i32, i32) {
    %c0_i32 = arith.constant 0 : i32
    %c0_i32_0 = arith.constant 0 : i32
    %c0_i32_1 = arith.constant 0 : i32
    return %arg0, %c0_i32, %c0_i32_0 : i32, i32, i32
  }
  func.func @transform_1(%arg0: i32) -> (i32, i32, i32) {
    %c0_i32 = arith.constant 0 : i32
    %c0_i32_0 = arith.constant 0 : i32
    %c0_i32_1 = arith.constant 0 : i32
    return %arg0, %c0_i32, %c0_i32_0 : i32, i32, i32
  }
  func.func @transform_2(%arg0: i32) -> (i32, i32, i32) {
    %c0_i32 = arith.constant 0 : i32
    %c0_i32_0 = arith.constant 0 : i32
    %c0_i32_1 = arith.constant 0 : i32
    return %arg0, %c0_i32, %c0_i32_0 : i32, i32, i32
  }
}

</mosaic_0001>

<bundles_post_ra>
// kernel: tpu_custom_call.1
= control target key start
LH: loop header
LB: loop body
LE: loop exit
PB: predicated region body
PF: predicated region fallthrough
CT: control target
= control target key end

     0   :  { %vm84_vm0 = vcmask 254976   ;;  %s230_s0 = inlined_call_operand.vmem [shape: f32[8,2,32], index: 0, kind: input, shape index: {}]   ;;  %s231_s1 = inlined_call_operand.vmem [shape: f32[100,1,32], index: 1, kind: input, shape index: {}]   ;;  %s232_s2 = inlined_call_operand.hbm [shape: f32[8,2,32], index: 2, kind: output, shape index: {}]  }
   0x1   :  { %v12_v0 = vld [vmem:[%s230_s0] sm:$0x3]  ;;  %v13_v3 = vld [vmem:[%s230_s0 + $0x2] sm:$0x3]  ;;  %v14_v5 = vld [vmem:[%s230_s0 + $0x4] sm:$0x3] }
   0x2   :  { %v109_v1 = vld [vmem:[%s231_s1] ss:$0 sm:$0xff]  ;;  %v110_v4 = vld [vmem:[%s231_s1 + $0x1] ss:$0 sm:$0xff]  ;;  %v111_v7 = vld [vmem:[%s231_s1 + $0x2] ss:$0 sm:$0xff] }
   0x3   :  { %v76_v2 = vadd.f32 %v109_v1, %v12_v0  ;;  %v77_v6 = vadd.f32 %v110_v4, %v13_v3  ;;  %v15_v8 = vld [vmem:[%s230_s0 + $0x6] sm:$0x3]  ;;  %v112_v9 = vld [vmem:[%s231_s1 + $0x3] ss:$0 sm:$0xff]  ;;  %v78_v10 = vadd.f32 %v111_v7, %v14_v5  ;;  %v16_v12 = vld [vmem:[%s230_s0 + $0x8] sm:$0x3] }
   0x4   :  { %v79_v11 = vadd.f32 %v112_v9, %v15_v8  ;;  %v113_v13 = vld [vmem:[%s231_s1 + $0x4] ss:$0 sm:$0xff]  ;;  %v17_v14 = vld [vmem:[%s230_s0 + $0xa] sm:$0x3]  ;;  %v114_v16 = vld [vmem:[%s231_s1 + $0x5] ss:$0 sm:$0xff] }
   0x5   :  { %85 = vst.msk [vmem:[#allocation2] sm:$0x3] %vm84_vm0, %v76_v2  ;;  %86 = vst.msk [vmem:[#allocation2 + $0x2] sm:$0x3] %vm84_vm0, %v77_v6  ;;  %v80_v15 = vadd.f32 %v113_v13, %v16_v12  ;;  %v18_v17 = vld [vmem:[%s230_s0 + $0xc] sm:$0x3]  ;;  %v81_v19 = vadd.f32 %v114_v16, %v17_v14 }
   0x6   :  { %v115_v18 = vld [vmem:[%s231_s1 + $0x6] ss:$0 sm:$0xff]  ;;  %87 = vst.msk [vmem:[#allocation2 + $0x4] sm:$0x3] %vm84_vm0, %v78_v10  ;;  %88 = vst.msk [vmem:[#allocation2 + $0x6] sm:$0x3] %vm84_vm0, %v79_v11 }
   0x7   :  { %v82_v20 = vadd.f32 %v115_v18, %v18_v17  ;;  %v19_v21 = vld [vmem:[%s230_s0 + $0xe] sm:$0x3]  ;;  %v116_v22 = vld [vmem:[%s231_s1 + $0x7] ss:$0 sm:$0xff] }
   0x8   :  { %7 = vsyncpa [#allocation3], 0  ;;  %89 = vst.msk [vmem:[#allocation2 + $0x8] sm:$0x3] %vm84_vm0, %v80_v15  ;;  %v83_v23 = vadd.f32 %v116_v22, %v19_v21  ;;  %s144_s13 = smov [#allocation2]  }
   0x9   :  { %s98_s14 = sshll.u32 %s144_s13, 4  ;;  %90 = vst.msk [vmem:[#allocation2 + $0xa] sm:$0x3] %vm84_vm0, %v81_v19  ;;  %91 = vst.msk [vmem:[#allocation2 + $0xc] sm:$0x3] %vm84_vm0, %v82_v20  ;;  %s99_s14 = int_to_ptr.vmem [resolvable:$true] %s98_s14 }
   0xa   :  { %92 = vst.msk [vmem:[#allocation2 + $0xe] sm:$0x3] %vm84_vm0, %v83_v23  ;;  %s120_s15 = scalar_lea.vmem %s99_s14, 256  ;;  %p125_p1 = scmp.lt.s32.totalorder %s99_s14, %s99_s14 }
   0xb   :  { %p121_p0 = scmp.ne.s32.totalorder %s99_s14, %s120_s15  ;;  %p126_p2 = scmp.lt.s32.totalorder %s120_s15, %s120_s15 }
   0xd   :  { %p127_p3 = por %p126_p2, %p125_p1 }
   0xf   :  { %p128_p4 = pnand %p127_p3, %p121_p0 }
  0x11   :  { %131 = shalt.err (!%p128_p4)
}
  0x12   :  { %s132_s16 = scalar_lea.hbm %s232_s2, 256 }
  0x13   :  { %p133_p5 = scmp.ne.s32.totalorder %s232_s2, %s132_s16  ;;  %p136_p6 = scmp.lt.u32.totalorder %s132_s16, %s232_s2 }
  0x15   :  { %p138_p7 = pnand %p136_p6, %p133_p5 }
  0x17   :  { %141 = shalt.err (!%p138_p7)
}
  0x18   :  { %s145_s21 = smov 32   ;;  %s146_s22 = smov 2  }
  0x19   :  { %104 = dma.vmem_to_hbm [thread:$0]  %s99_s14, 256, %s232_s2, [#allocation3], %s145_s21, %s145_s21, %s146_s22  }
  0x1a   :  { %142 = dma.done.wait [#allocation3], 256  }
  0x1b   :  { %143 = vsyncadd [#allocation3], 4294967040 }
  0x1c   :  { %108 = vsyncpa [#allocation3], 1 }

</bundles_post_ra>
